<compile_context>
chip_gen: v7x
topology: tpu7x:2x2x1
jax: 0.10.0
libtpu: 0.0.40
codegen_flags: <defaults>
</compile_context>

<pallas_src>
import functools

import jax
import jax.numpy as jnp
from jax.experimental import pallas as pl
from jax.experimental.pallas import tpu as pltpu

SUBLANE = 8


def _round_up(x, m):
    return (x + m - 1) // m * m


def _default_tanh_dtype():
    """bf16 tanh on chips with a bf16 EUP (v6e/v7x); f32 on v5e and older."""
    try:
        kind = jax.devices()[0].device_kind.lower()
    except Exception:
        return jnp.float32
    return jnp.bfloat16 if ("v6" in kind or "v7" in kind) else jnp.float32


# ----------------------------- Pallas kernel --------------------------------
def mlp_policy_kernel(obs_ref,
                      w1_ref, b1_ref,
                      w2_ref, b2_ref,
                      w3_ref, b3_ref,
                      std_ref, eps_ref,
                      out_ref, *, tanh_dtype):
    """Fused 2-hidden-layer MLP (tanh) + reparameterized Gaussian sample.

    One grid step processes a (tb, ·) batch tile.  Weights are bf16 and stay
    VMEM-resident across the whole grid (constant index_maps); dots accumulate
    in f32 on the MXU; the final sample is f32.
    """
    # obs arrives f32 straight from the caller (no wrapper copy); cast is a
    # cheap VPU op that overlaps with the first matmul's weight feed.
    x = obs_ref[...].astype(jnp.bfloat16)                               # (tb, ob_dim)

    # hidden layer 1: Linear + tanh
    h = jnp.dot(x, w1_ref[...], preferred_element_type=jnp.float32) + b1_ref[...]
    h = jnp.tanh(h.astype(tanh_dtype)).astype(jnp.bfloat16)
    # hidden layer 2: Linear + tanh
    h = jnp.dot(h, w2_ref[...], preferred_element_type=jnp.float32) + b2_ref[...]
    h = jnp.tanh(h.astype(tanh_dtype)).astype(jnp.bfloat16)
    # output layer: Linear (identity) -> mean
    mean = jnp.dot(h, w3_ref[...], preferred_element_type=jnp.float32) + b3_ref[...]

    # rsample with covariance = diag(exp(logstd)); std = exp(0.5*logstd) is
    # precomputed once in prepare_params (hoisted out of the per-call path).
    out_ref[...] = mean + std_ref[...] * eps_ref[...]                   # (tb, ac_dim) f32


# --------------------------- one-time parameter prep -------------------------
def prepare_params(params, logstd):
    """Hoisted out of the per-call path.  Weights -> bf16 (native MXU rate,
    half the resident bytes), biases -> (1, n) f32, logstd -> per-dim std."""
    assert len(params) == 3, "kernel is specialized to n_layers == 2 (hw5 default)"
    (w1, b1), (w2, b2), (w3, b3) = params
    bf16, f32 = jnp.bfloat16, jnp.float32
    return (
        w1.astype(bf16), b1.reshape(1, -1).astype(f32),
        w2.astype(bf16), b2.reshape(1, -1).astype(f32),
        w3.astype(bf16), b3.reshape(1, -1).astype(f32),
        jnp.exp(0.5 * logstd.astype(f32)).reshape(1, -1),   # covariance -> std
    )


# ------------------------------ JAX wrapper ----------------------------------
def mlp_policy_forward(obs, prepped, eps, *, batch_tile=None, tanh_dtype=None):
    """obs: (B, ob_dim) f32.  prepped: output of prepare_params.
    eps: (B, ac_dim) standard-normal noise for rsample.  Returns (B, ac_dim) f32."""
    w1, b1, w2, b2, w3, b3, std = prepped
    B, ob_dim = obs.shape
    size1, size2, ac_dim = w1.shape[1], w2.shape[1], w3.shape[1]
    assert w1.shape[0] == ob_dim and eps.shape == (B, ac_dim)

    if tanh_dtype is None:
        tanh_dtype = _default_tanh_dtype()

    # Batch tile: multiple of 8 sublanes, capped at 1024 rows.  For large B the
    # default guarantees >= 2 grid steps so the "parallel" batch axis feeds both
    # v7x TensorCores.  No batch padding: grid = cdiv(B, tb); the partial tail
    # block is masked by Pallas (OOB rows are discarded on write and nothing
    # reduces across rows).
    if batch_tile is None:
        batch_tile = min(1024, _round_up(pl.cdiv(B, 2), SUBLANE))
    tb = max(SUBLANE, min(_round_up(batch_tile, SUBLANE), _round_up(B, SUBLANE)))
    grid = (pl.cdiv(B, tb),)

    def tiled(cols):       # batch-streamed operand: new block every grid step
        return pl.BlockSpec((tb, cols), lambda i: (i, 0))

    def resident(shape):   # weights / biases / std: same block -> stays in VMEM
        return pl.BlockSpec(shape, lambda i: (0, 0))

    kernel = functools.partial(mlp_policy_kernel, tanh_dtype=tanh_dtype)

    # VMEM footprint: resident params < 5 KiB, double-buffered streamed tiles
    # < 300 KiB even at tb=1024 — far inside every generation's scoped limit.
    return pl.pallas_call(
        kernel,
        out_shape=jax.ShapeDtypeStruct((B, ac_dim), jnp.float32),
        grid=grid,
        in_specs=[
            tiled(ob_dim),                 # obs  (streamed, true lane width)
            resident((ob_dim, size1)),     # W1   bf16
            resident((1, size1)),          # b1   f32
            resident((size1, size2)),      # W2   bf16
            resident((1, size2)),          # b2   f32
            resident((size2, ac_dim)),     # W3   bf16
            resident((1, ac_dim)),         # b3   f32
            resident((1, ac_dim)),         # std  f32
            tiled(ac_dim),                 # eps  (streamed, true lane width)
        ],
        # TODO(synk): if the 8-lane output ever shows measurable vst.msk cost,
        # pad only the output to 128 lanes (never eps) and slice in the wrapper.
        out_specs=tiled(ac_dim),
        compiler_params=pltpu.CompilerParams(
            dimension_semantics=("parallel",),   # shard batch tiles across TCs (v7x)
            vmem_limit_bytes=16 * 1024 * 1024,
        ),
    )(obs, w1, b1, w2, b2, w3, b3, std, eps)


# ----------------------------- pure-JAX reference -----------------------------
def mlp_policy_reference(obs, params, logstd, eps, *, tanh_dtype=jnp.float32):
    """Same math as the kernel (bf16 weights/activations, f32 accumulation,
    tanh in tanh_dtype) without Pallas, for checking."""
    (w1, b1), (w2, b2), (w3, b3) = params

    def dot(a, w):
        return jnp.dot(a.astype(jnp.bfloat16), w.astype(jnp.bfloat16),
                       preferred_element_type=jnp.float32)

    h = dot(obs, w1) + b1.reshape(1, -1)
    h = jnp.tanh(h.astype(tanh_dtype)).astype(jnp.float32)
    h = dot(h, w2) + b2.reshape(1, -1)
    h = jnp.tanh(h.astype(tanh_dtype)).astype(jnp.float32)
    mean = dot(h, w3) + b3.reshape(1, -1)
    return mean + jnp.exp(0.5 * logstd.reshape(1, -1)) * eps


# --------------------------- deterministic init -------------------------------
def init_params(key, ob_dim, size, ac_dim, n_layers=2):
    """Deterministic synthetic init (PyTorch-Linear-like uniform fan-in scaling)."""
    dims = [ob_dim] + [size] * n_layers + [ac_dim]
    params = []
    for i in range(len(dims) - 1):
        key, kw, kb = jax.random.split(key, 3)
        bound = 1.0 / jnp.sqrt(dims[i])
        W = jax.random.uniform(kw, (dims[i], dims[i + 1]), jnp.float32, -bound, bound)
        b = jax.random.uniform(kb, (dims[i + 1],), jnp.float32, -bound, bound)
        params.append((W, b))
    return params, key


if __name__ == "__main__":
    # Small shapes consistent with the module's forward (obs -> action sample).
    B, ob_dim, size, ac_dim, n_layers = 8, 16, 32, 8, 2

    key = jax.random.PRNGKey(0)
    params, key = init_params(key, ob_dim, size, ac_dim, n_layers)

    # logstd parameter is initialized to zeros in the module (__init__).
    logstd = jnp.zeros((ac_dim,), dtype=jnp.float32)

    # One-time parameter prep (cached / reused across every forward call).
    prepped = prepare_params(params, logstd)
    tanh_dtype = _default_tanh_dtype()

    key, k_obs, k_eps = jax.random.split(key, 3)
    obs = jax.random.normal(k_obs, (B, ob_dim), dtype=jnp.float32)
    # TODO(synk): rsample's internal torch RNG has no JAX-state equivalent; the
    # standard-normal noise is drawn deterministically here and passed in.
    eps = jax.random.normal(k_eps, (B, ac_dim), dtype=jnp.float32)

    act = mlp_policy_forward(obs, prepped, eps)
    jax.block_until_ready(act)
    ref = mlp_policy_reference(obs, params, logstd, eps, tanh_dtype=tanh_dtype)
    assert act.shape == (B, ac_dim)
    err = float(jnp.max(jnp.abs(act - ref)))
    assert err < 5e-3, err

    # Larger batch: exercises >=2 grid steps (both v7x TCs) and a partial
    # (masked) tail block with no wrapper-side padding copies.
    B2 = 1000
    key, k_obs2, k_eps2 = jax.random.split(key, 3)
    obs2 = jax.random.normal(k_obs2, (B2, ob_dim), dtype=jnp.float32)
    eps2 = jax.random.normal(k_eps2, (B2, ac_dim), dtype=jnp.float32)
    act2 = mlp_policy_forward(obs2, prepped, eps2)
    jax.block_until_ready(act2)
    ref2 = mlp_policy_reference(obs2, params, logstd, eps2, tanh_dtype=tanh_dtype)
    assert act2.shape == (B2, ac_dim)
    err2 = float(jnp.max(jnp.abs(act2 - ref2)))
    assert err2 < 5e-3, err2

    print("KERNEL_OK")
</pallas_src>

<mosaic_0001>
module attributes {stable_mosaic.version = 11 : i64} {
  func.func @mlp_policy_kernel(%arg0: i32, %arg1: memref<8x16xf32, #tpu.memory_space<vmem>>, %arg2: memref<16x32xbf16, #tpu.memory_space<vmem>>, %arg3: memref<1x32xf32, #tpu.memory_space<vmem>>, %arg4: memref<32x32xbf16, #tpu.memory_space<vmem>>, %arg5: memref<1x32xf32, #tpu.memory_space<vmem>>, %arg6: memref<32x8xbf16, #tpu.memory_space<vmem>>, %arg7: memref<1x8xf32, #tpu.memory_space<vmem>>, %arg8: memref<1x8xf32, #tpu.memory_space<vmem>>, %arg9: memref<8x8xf32, #tpu.memory_space<vmem>>, %arg10: memref<8x8xf32, #tpu.memory_space<vmem>>) attributes {dimension_semantics = [#tpu.dimension_semantics<parallel>], iteration_bounds = array<i64: 1>, scalar_prefetch = 0 : i64, scratch_operands = 0 : i64, tpu.core_type = #tpu.core_type<tc>, window_params = [{transform_indices = @transform_0, window_bounds = array<i64: 8, 16>}, {pipeline_mode = #tpu.pipeline_mode<synchronous>, transform_indices = @transform_1, window_bounds = array<i64: 16, 32>}, {pipeline_mode = #tpu.pipeline_mode<synchronous>, transform_indices = @transform_2, window_bounds = array<i64: 1, 32>}, {pipeline_mode = #tpu.pipeline_mode<synchronous>, transform_indices = @transform_3, window_bounds = array<i64: 32, 32>}, {pipeline_mode = #tpu.pipeline_mode<synchronous>, transform_indices = @transform_4, window_bounds = array<i64: 1, 32>}, {pipeline_mode = #tpu.pipeline_mode<synchronous>, transform_indices = @transform_5, window_bounds = array<i64: 32, 8>}, {pipeline_mode = #tpu.pipeline_mode<synchronous>, transform_indices = @transform_6, window_bounds = array<i64: 1, 8>}, {pipeline_mode = #tpu.pipeline_mode<synchronous>, transform_indices = @transform_7, window_bounds = array<i64: 1, 8>}, {transform_indices = @transform_8, window_bounds = array<i64: 8, 8>}, {transform_indices = @transform_9, window_bounds = array<i64: 8, 8>}]} {
    %c0 = arith.constant 0 : index
    %c0_0 = arith.constant 0 : index
    %0 = vector.load %arg1[%c0, %c0_0] : memref<8x16xf32, #tpu.memory_space<vmem>>, vector<8x16xf32>
    %1 = arith.truncf %0 : vector<8x16xf32> to vector<8x16xbf16>
    %c0_1 = arith.constant 0 : index
    %c0_2 = arith.constant 0 : index
    %2 = vector.load %arg2[%c0_1, %c0_2] : memref<16x32xbf16, #tpu.memory_space<vmem>>, vector<16x32xbf16>
    %cst = arith.constant dense<0.000000e+00> : vector<8x32xf32>
    %3 = tpu.matmul %1, %2, %cst {dimension_numbers = #tpu.dot_dimension_numbers<[1], [0], [0], [1], [0, 0, 1, 1], [], []>} : vector<8x16xbf16>, vector<16x32xbf16>, vector<8x32xf32> -> vector<8x32xf32>
    %c0_3 = arith.constant 0 : index
    %c0_4 = arith.constant 0 : index
    %4 = vector.load %arg3[%c0_3, %c0_4] : memref<1x32xf32, #tpu.memory_space<vmem>>, vector<1x32xf32>
    %5 = vector.broadcast %4 : vector<1x32xf32> to vector<8x32xf32>
    %6 = arith.addf %3, %5 : vector<8x32xf32>
    %7 = math.tanh %6 : vector<8x32xf32>
    %8 = arith.truncf %7 : vector<8x32xf32> to vector<8x32xbf16>
    %c0_5 = arith.constant 0 : index
    %c0_6 = arith.constant 0 : index
    %9 = vector.load %arg4[%c0_5, %c0_6] : memref<32x32xbf16, #tpu.memory_space<vmem>>, vector<32x32xbf16>
    %cst_7 = arith.constant dense<0.000000e+00> : vector<8x32xf32>
    %10 = tpu.matmul %8, %9, %cst_7 {dimension_numbers = #tpu.dot_dimension_numbers<[1], [0], [0], [1], [0, 0, 1, 1], [], []>} : vector<8x32xbf16>, vector<32x32xbf16>, vector<8x32xf32> -> vector<8x32xf32>
    %c0_8 = arith.constant 0 : index
    %c0_9 = arith.constant 0 : index
    %11 = vector.load %arg5[%c0_8, %c0_9] : memref<1x32xf32, #tpu.memory_space<vmem>>, vector<1x32xf32>
    %12 = vector.broadcast %11 : vector<1x32xf32> to vector<8x32xf32>
    %13 = arith.addf %10, %12 : vector<8x32xf32>
    %14 = math.tanh %13 : vector<8x32xf32>
    %15 = arith.truncf %14 : vector<8x32xf32> to vector<8x32xbf16>
    %c0_10 = arith.constant 0 : index
    %c0_11 = arith.constant 0 : index
    %16 = vector.load %arg6[%c0_10, %c0_11] : memref<32x8xbf16, #tpu.memory_space<vmem>>, vector<32x8xbf16>
    %cst_12 = arith.constant dense<0.000000e+00> : vector<8x8xf32>
    %17 = tpu.matmul %15, %16, %cst_12 {dimension_numbers = #tpu.dot_dimension_numbers<[1], [0], [0], [1], [0, 0, 1, 1], [], []>} : vector<8x32xbf16>, vector<32x8xbf16>, vector<8x8xf32> -> vector<8x8xf32>
    %c0_13 = arith.constant 0 : index
    %c0_14 = arith.constant 0 : index
    %18 = vector.load %arg7[%c0_13, %c0_14] : memref<1x8xf32, #tpu.memory_space<vmem>>, vector<1x8xf32>
    %19 = vector.broadcast %18 : vector<1x8xf32> to vector<8x8xf32>
    %20 = arith.addf %17, %19 : vector<8x8xf32>
    %c0_15 = arith.constant 0 : index
    %c0_16 = arith.constant 0 : index
    %21 = vector.load %arg8[%c0_15, %c0_16] : memref<1x8xf32, #tpu.memory_space<vmem>>, vector<1x8xf32>
    %c0_17 = arith.constant 0 : index
    %c0_18 = arith.constant 0 : index
    %22 = vector.load %arg9[%c0_17, %c0_18] : memref<8x8xf32, #tpu.memory_space<vmem>>, vector<8x8xf32>
    %23 = vector.broadcast %21 : vector<1x8xf32> to vector<8x8xf32>
    %24 = arith.mulf %23, %22 : vector<8x8xf32>
    %25 = arith.addf %20, %24 : vector<8x8xf32>
    %c0_19 = arith.constant 0 : index
    %c0_20 = arith.constant 0 : index
    %26 = vector.load %arg10[%c0_19, %c0_20] : memref<8x8xf32, #tpu.memory_space<vmem>>, vector<8x8xf32>
    tpu.vector_store %arg10[%c0_19, %c0_20], %25 {strides = array<i32>} : memref<8x8xf32, #tpu.memory_space<vmem>>, vector<8x8xf32>,
    return
  }
  func.func @transform_0(%arg0: i32) -> (i32, i32) {
    %c0_i32 = arith.constant 0 : i32
    %c0_i32_0 = arith.constant 0 : i32
    return %arg0, %c0_i32 : i32, i32
  }
  func.func @transform_1(%arg0: i32) -> (i32, i32) {
    %c0_i32 = arith.constant 0 : i32
    %c0_i32_0 = arith.constant 0 : i32
    %c0_i32_1 = arith.constant 0 : i32
    return %c0_i32, %c0_i32_0 : i32, i32
  }
  func.func @transform_2(%arg0: i32) -> (i32, i32) {
    %c0_i32 = arith.constant 0 : i32
    %c0_i32_0 = arith.constant 0 : i32
    %c0_i32_1 = arith.constant 0 : i32
    return %c0_i32, %c0_i32_0 : i32, i32
  }
  func.func @transform_3(%arg0: i32) -> (i32, i32) {
    %c0_i32 = arith.constant 0 : i32
    %c0_i32_0 = arith.constant 0 : i32
    %c0_i32_1 = arith.constant 0 : i32
    return %c0_i32, %c0_i32_0 : i32, i32
  }
  func.func @transform_4(%arg0: i32) -> (i32, i32) {
    %c0_i32 = arith.constant 0 : i32
    %c0_i32_0 = arith.constant 0 : i32
    %c0_i32_1 = arith.constant 0 : i32
    return %c0_i32, %c0_i32_0 : i32, i32
  }
  func.func @transform_5(%arg0: i32) -> (i32, i32) {
    %c0_i32 = arith.constant 0 : i32
    %c0_i32_0 = arith.constant 0 : i32
    %c0_i32_1 = arith.constant 0 : i32
    return %c0_i32, %c0_i32_0 : i32, i32
  }
  func.func @transform_6(%arg0: i32) -> (i32, i32) {
    %c0_i32 = arith.constant 0 : i32
    %c0_i32_0 = arith.constant 0 : i32
    %c0_i32_1 = arith.constant 0 : i32
    return %c0_i32, %c0_i32_0 : i32, i32
  }
  func.func @transform_7(%arg0: i32) -> (i32, i32) {
    %c0_i32 = arith.constant 0 : i32
    %c0_i32_0 = arith.constant 0 : i32
    %c0_i32_1 = arith.constant 0 : i32
    return %c0_i32, %c0_i32_0 : i32, i32
  }
  func.func @transform_8(%arg0: i32) -> (i32, i32) {
    %c0_i32 = arith.constant 0 : i32
    %c0_i32_0 = arith.constant 0 : i32
    return %arg0, %c0_i32 : i32, i32
  }
  func.func @transform_9(%arg0: i32) -> (i32, i32) {
    %c0_i32 = arith.constant 0 : i32
    %c0_i32_0 = arith.constant 0 : i32
    return %arg0, %c0_i32 : i32, i32
  }
}

</mosaic_0001>

<bundles_post_ra>
// kernel: tpu_custom_call.1
= control target key start
LH: loop header
LB: loop body
LE: loop exit
PB: predicated region body
PF: predicated region fallthrough
CT: control target
= control target key end

     0   :  { %14 = vsyncpa [#allocation3], 0  ;;  %s490_s0 = inlined_call_operand.vmem [shape: f32[8,16], index: 0, kind: input, shape index: {}]   ;;  %s491_s1 = inlined_call_operand.hbm [shape: bf16[16,32], index: 1, kind: input, shape index: {}]   ;;  %s492_s2 = inlined_call_operand.vmem [shape: f32[1,32], index: 2, kind: input, shape index: {}]   ;;  %s493_s3 = inlined_call_operand.vmem [shape: bf16[32,32], index: 3, kind: input, shape index: {}]   ;;  %s494_s4 = inlined_call_operand.vmem [shape: f32[1,32], index: 4, kind: input, shape index: {}]   ;;  %s495_s5 = inlined_call_operand.vmem [shape: bf16[32,8], index: 5, kind: input, shape index: {}]   ;;  %s496_s6 = inlined_call_operand.vmem [shape: f32[1,8], index: 6, kind: input, shape index: {}]   ;;  %s497_s7 = inlined_call_operand.vmem [shape: f32[1,8], index: 7, kind: input, shape index: {}]   ;;  %s498_s8 = inlined_call_operand.vmem [shape: f32[8,8], index: 8, kind: input, shape index: {}]   ;;  %s499_s9 = inlined_call_operand.hbm [shape: f32[8,8], index: 9, kind: output, shape index: {}]  }
   0x1   :  { %15 = vsyncpa [#allocation4], 0  ;;  %s378_s30 = smov [#allocation2]   ;;  %s330_s13 = scalar_lea.hbm %s491_s1, 128 }
   0x2   :  { %s23_s10 = sshll.u32 %s378_s30, 4  ;;  %p331_p0 = scmp.ne.s32.totalorder %s491_s1, %s330_s13  ;;  %s24_s10 = int_to_ptr.vmem [resolvable:$true] %s23_s10 }
   0x3   :  { %p334_p1 = scmp.lt.u32.totalorder %s330_s13, %s491_s1 }
   0x5   :  { %p336_p2 = pnand %p334_p1, %p331_p0 }
   0x7   :  { %339 = shalt.err (!%p336_p2)
}
   0x8   :  { %s340_s18 = scalar_lea.vmem %s24_s10, 128  ;;  %p345_p4 = scmp.lt.s32.totalorder %s24_s10, %s24_s10 }
   0x9   :  { %p341_p3 = scmp.ne.s32.totalorder %s24_s10, %s340_s18  ;;  %p346_p5 = scmp.lt.s32.totalorder %s340_s18, %s340_s18 }
   0xb   :  { %p347_p6 = por %p346_p5, %p345_p4 }
   0xd   :  { %p348_p7 = pnand %p347_p6, %p341_p3 }
   0xf   :  { %351 = shalt.err (!%p348_p7)
}
  0x10   :  { %s379_s19 = smov 64   ;;  %s380_s20 = smov 4  }
  0x11   :  { %29 = dma.hbm_to_vmem [thread:$0]  %s491_s1, 128, %s24_s10, [#allocation3], %s379_s19, %s379_s19, %s380_s20  }
  0x12   :  { %374 = dma.done.wait [#allocation3], 128  }
  0x13   :  { %375 = vsyncadd [#allocation3], 4294967168  ;;  %v381_v0 = vmov 0.0   ;;  %vm382_vm0 = vmmov 0   ;;  %v321_v1 = vld [vmem:[#allocation2] sm:$0xff]   ;;  %vm65_vm1 = vcmask 130048  }
  0x14   :  { %293 = vmatprep.subr.bf16.mxu0 %v381_v0  ;;  %295 = vmatprep.mubr.msk.bf16.mxu0 %vm382_vm0, %v381_v0  ;;  %v48_v2 = vld [vmem:[%s490_s0] sm:$0xff]  ;;  %v323_v5 = vld [vmem:[%s493_s3 + $0x8] sm:$0xff]   ;;  %vm134_vm2 = vcmask 261120   ;;  %s383_s16 = smov [#allocation5]   ;;  %vm256_vm3 = vcmask 64512  }
  0x15   :  { %299 = vmatprep.subr.bf16.mxu1 %v381_v0  ;;  %303 = vmatprep.mubr.msk.bf16.mxu1 %vm382_vm0, %v381_v0  ;;  %v49_v3 = vpack.c.bf16 %v48_v2, %v48_v2  ;;  %v322_v4 = vld [vmem:[%s493_s3] sm:$0xff]   ;;  %v325_v15 = vld [vmem:[%s495_s5 + $0x8] sm:$0xff]   ;;  %s264_s17 = sshll.u32 %s383_s16, 4  ;;  %s265_s17 = int_to_ptr.vmem [resolvable:$true] %s264_s17 }
  0x16   :  { %294 = vmatpush3.bf16.msra.mxu0 %v321_v1  ;;  %300 = vmatpush3.bf16.msra.mxu1 %v322_v4  ;;  %v273_v6 = vld [vmem:[%s492_s2] ss:$0 sm:$0xff]  ;;  %p357_p9 = scmp.lt.s32.totalorder %s265_s17, %s265_s17 }
  0x17   :  { %307 = vmatprep.subr.bf16.mxu0 %v381_v0  ;;  %301 = vmatprep.subr.bf16.mxu1 %v381_v0  ;;  %v324_v14 = vld [vmem:[%s495_s5] sm:$0xff]  }
  0x18   :  { %v276_v16 = vld [vmem:[%s494_s4] ss:$0 sm:$0xff] }
  0x19   :  { %296 = vmatmul.mubr.msk.bf16.vlgmr.msra.gmra.mrb[0].mxu0 %vm65_vm1, %v49_v3  ;;  %v284_v24 = vld [vmem:[%s497_s7] ss:$0 sm:$0xff]  ;;  %s352_s7 = scalar_lea.vmem %s265_s17, 128 }
  0x1a   :  { %311 = vmatprep.mubr.msk.bf16.mxu0 %vm382_vm0, %v381_v0  ;;  %302 = vmatpush3.bf16.msra.mxu1 %v323_v5  ;;  %v247_v25 = vld [vmem:[%s498_s8] sm:$0xff]  ;;  %p353_p8 = scmp.ne.s32.totalorder %s265_s17, %s352_s7  ;;  %p358_p10 = scmp.lt.s32.totalorder %s352_s7, %s352_s7 }
  0x1b   :  { %308 = vmatpush3.bf16.msra.mxu0 %v324_v14  ;;  %v280_v26 = vld [vmem:[%s496_s6] ss:$0 sm:$0xff]  ;;  %v254_v27 = vmul.f32 %v284_v24, %v247_v25 }
  0x1c   :  { %309 = vmatprep.subr.bf16.mxu0 %v381_v0  ;;  %p359_p11 = por %p358_p10, %p357_p9 }
  0x1e   :  { %p360_p12 = pnand %p359_p11, %p353_p8 }
  0x1f   :  { %310 = vmatpush3.bf16.msra.mxu0 %v325_v15 }
  0xec   :  { %v103_v7 = vpop.f32.mrb[0].mxu0 }
  0xed   :  { %v104_v8 = vadd.f32 %v273_v6, %v103_v7  ;;  %v297_v9 = vpop.f32.mrb[1].mxu0 }
  0xee   :  { %v106_v10 = vpop.f32.mrb[2].mxu0 }
  0xef   :  { %326 = vtanh.f32 %v104_v8  ;;  %v298_v11 = vpop.f32.mrb[3].mxu0 }
  0xf9   :  { %v327_v12 = vpop.eup %326 }
  0xfa   :  { %v110_v13 = vpack.c.bf16 %v327_v12, %v327_v12 }
  0xfc   :  { %304 = vmatmul.mubr.msk.bf16.vlgmr.msra.gmra.mrb[0].mxu1 %vm134_vm2, %v110_v13 }
 0x1cf   :  { %v172_v17 = vpop.f32.mrb[0].mxu1 }
 0x1d0   :  { %v173_v18 = vadd.f32 %v276_v16, %v172_v17  ;;  %v305_v19 = vpop.f32.mrb[1].mxu1 }
 0x1d1   :  { %v175_v20 = vpop.f32.mrb[2].mxu1 }
 0x1d2   :  { %328 = vtanh.f32 %v173_v18  ;;  %v306_v21 = vpop.f32.mrb[3].mxu1 }
 0x1dc   :  { %v329_v22 = vpop.eup %328 }
 0x1dd   :  { %v179_v23 = vpack.c.bf16 %v329_v22, %v329_v22 }
 0x1df   :  { %312 = vmatmul.mubr.msk.bf16.vlgmr.msra.gmra.mrb[4].mxu0 %vm134_vm2, %v179_v23 }
 0x2b2   :  { %v240_v28 = vpop.f32.mrb[4].mxu0 }
 0x2b3   :  { %v241_v29 = vadd.f32 %v280_v26, %v240_v28  ;;  %v313_v30 = vpop.f32.mrb[5].mxu0 }
 0x2b4   :  { %v243_v31 = vpop.f32.mrb[6].mxu0 }
 0x2b5   :  { %v255_v32 = vadd.f32 %v254_v27, %v241_v29  ;;  %v314_v33 = vpop.f32.mrb[7].mxu0 }
 0x2b7   :  { %257 = vst.msk [vmem:[#allocation5] sm:$0xff] %vm256_vm3, %v255_v32 }
 0x2b8   :  { %363 = shalt.err (!%p360_p12)
}
 0x2b9   :  { %s364_s18 = scalar_lea.hbm %s499_s9, 128 }
 0x2ba   :  { %p365_p13 = scmp.ne.s32.totalorder %s499_s9, %s364_s18  ;;  %p368_p0 = scmp.lt.u32.totalorder %s364_s18, %s499_s9 }
 0x2bc   :  { %p370_p1 = pnand %p368_p0, %p365_p13 }
 0x2be   :  { %373 = shalt.err (!%p370_p1)
}
 0x2bf   :  { %267 = dma.vmem_to_hbm [thread:$0]  %s265_s17, 128, %s499_s9, [#allocation4]  }
 0x2c0   :  { %376 = dma.done.wait [#allocation4], 128  }
 0x2c1   :  { %377 = vsyncadd [#allocation4], 4294967168 }
 0x2c2   :  { %271 = vsyncpa [#allocation3], 1 }
 0x2c3   :  { %272 = vsyncpa [#allocation4], 1 }

</bundles_post_ra>
